<compile_context>
chip_gen: v7x
topology: tpu7x:2x2x1
jax: 0.10.0
libtpu: 0.0.40
codegen_flags: <defaults>
</compile_context>

<pallas_src>
import functools
import math

import jax
import jax.numpy as jnp
from jax.experimental import pallas as pl
from jax.experimental.pallas import tpu as pltpu

CLINICAL_FEATURE_COUNT = 32      # input_dim
NUM_ACTIONS = 5                  # number_of_actions
NUM_ATOMS = 51                   # RAINBOW_CONFIG['num_atoms']
V_MIN, V_MAX = -10.0, 10.0       # RAINBOW_CONFIG['v_min'/'v_max'] (support buffer)
STD_INIT = 0.5


def _round_up(n, m):
    return -(-n // m) * m


def _dqn_kernel(num_actions, num_atoms, atom_pad,
                x_ref,
                w1_ref, b1_ref, w2_ref, b2_ref, w3_ref, b3_ref,
                vw1_ref, vb1_ref, vw2_ref, vb2_ref,
                aw1_ref, ab1_ref, aw2_ref, ab2_ref,
                out_ref):
    def dense(a, w_ref, b_ref, relu=True):
        # bf16 operands on the MXU, f32 accumulation + f32 VPU epilogue.
        y = jnp.dot(a, w_ref[...], preferred_element_type=jnp.float32) + b_ref[...]
        if relu:
            y = jnp.maximum(y, 0.0)
        return y

    x = x_ref[...]                                              # (TB, 32) bf16

    # Shared feature trunk: 3 x (Linear + ReLU) -> (TB, 256)
    h = dense(x, w1_ref, b1_ref).astype(jnp.bfloat16)
    h = dense(h, w2_ref, b2_ref).astype(jnp.bfloat16)
    h = dense(h, w3_ref, b3_ref).astype(jnp.bfloat16)

    # Value stream: NoisyLinear(256,128)+ReLU -> NoisyLinear(128, atom_pad)
    v = dense(h, vw1_ref, vb1_ref).astype(jnp.bfloat16)         # (TB, 128)
    v = dense(v, vw2_ref, vb2_ref, relu=False)                  # (TB, atom_pad) f32

    # Advantage stream: NoisyLinear(256,128)+ReLU -> ONE matmul (TB, A*atom_pad)
    a_h = dense(h, aw1_ref, ab1_ref).astype(jnp.bfloat16)       # (TB, 128)
    adv = dense(a_h, aw2_ref, ab2_ref, relu=False)              # (TB, A*atom_pad) f32

    # Mean over actions, per atom column (lane-aligned 128-wide slices).
    adv_mean = adv[:, 0:atom_pad]
    for i in range(1, num_actions):
        adv_mean = adv_mean + adv[:, i * atom_pad:(i + 1) * atom_pad]
    adv_mean = adv_mean * (1.0 / num_actions)

    # Mask for the zero-padded atom lanes (>= num_atoms).
    lane = jax.lax.broadcasted_iota(jnp.int32, (1, atom_pad), 1)
    valid = lane < num_atoms
    neg_big = jnp.float32(-1e30)

    # Dueling combine + C51 softmax over (real) atoms; lane-dense stores.
    for i in range(num_actions):
        q = v + adv[:, i * atom_pad:(i + 1) * atom_pad] - adv_mean
        q = jnp.where(valid, q, neg_big)                        # padded lanes -> ~0 prob
        q = q - jnp.max(q, axis=-1, keepdims=True)
        e = jnp.exp(q)
        p = e / jnp.sum(e, axis=-1, keepdims=True)
        out_ref[:, i * atom_pad:(i + 1) * atom_pad] = p


def init_params(key,
                input_dim=CLINICAL_FEATURE_COUNT,
                num_actions=NUM_ACTIONS,
                num_atoms=NUM_ATOMS):
    """Deterministic parameter init mirroring the PyTorch module's __init__.

    Returns weights pre-transposed to (in, out), atom dims zero-padded to a
    lane multiple, weights cast to bf16 (MXU operands), biases kept f32.
    """
    atom_pad = _round_up(num_atoms, 128)
    keys = jax.random.split(key, 7)

    def linear(k, fan_in, fan_out):
        kw, kb = jax.random.split(k)
        bound = 1.0 / math.sqrt(fan_in)
        w = jax.random.uniform(kw, (fan_out, fan_in), jnp.float32, -bound, bound)
        b = jax.random.uniform(kb, (fan_out,), jnp.float32, -bound, bound)
        return w, b

    def scale_noise(k, size):
        z = jax.random.normal(k, (size,), jnp.float32)
        return jnp.sign(z) * jnp.sqrt(jnp.abs(z))

    def noisy_linear(k, fan_in, fan_out):
        kw, kb, kin, kout = jax.random.split(k, 4)
        mu_range = 1.0 / math.sqrt(fan_in)
        w_mu = jax.random.uniform(kw, (fan_out, fan_in), jnp.float32, -mu_range, mu_range)
        b_mu = jax.random.uniform(kb, (fan_out,), jnp.float32, -mu_range, mu_range)
        w_sigma = jnp.full((fan_out, fan_in), STD_INIT / math.sqrt(fan_in), jnp.float32)
        b_sigma = jnp.full((fan_out,), STD_INIT / math.sqrt(fan_out), jnp.float32)
        eps_in = scale_noise(kin, fan_in)
        eps_out = scale_noise(kout, fan_out)
        w_eps = jnp.outer(eps_out, eps_in)
        # Module default is train(): effective weight includes the noise term.
        return w_mu + w_sigma * w_eps, b_mu + b_sigma * eps_out

    w1, b1 = linear(keys[0], input_dim, 64)
    w2, b2 = linear(keys[1], 64, 128)
    w3, b3 = linear(keys[2], 128, 256)
    vw1, vb1 = noisy_linear(keys[3], 256, 128)
    vw2, vb2 = noisy_linear(keys[4], 128, num_atoms)
    aw1, ab1 = noisy_linear(keys[5], 256, 128)
    aw2, ab2 = noisy_linear(keys[6], 128, num_actions * num_atoms)

    def prep(w, b):
        # (out, in) -> (in, out) bf16 weight; (1, out) f32 bias.
        return w.T.astype(jnp.bfloat16), b[None, :].astype(jnp.float32)

    def prep_atoms(w, b):
        # value output layer: pad atom dim to atom_pad lanes.
        wt = jnp.pad(w.T, ((0, 0), (0, atom_pad - num_atoms)))
        bt = jnp.pad(b, (0, atom_pad - num_atoms))[None, :]
        return wt.astype(jnp.bfloat16), bt.astype(jnp.float32)

    def prep_adv(w, b):
        # advantage output layer: per-action blocks padded to atom_pad lanes.
        fan_in = w.shape[1]
        wt = w.T.reshape(fan_in, num_actions, num_atoms)
        wt = jnp.pad(wt, ((0, 0), (0, 0), (0, atom_pad - num_atoms)))
        wt = wt.reshape(fan_in, num_actions * atom_pad)
        bt = jnp.pad(b.reshape(num_actions, num_atoms),
                     ((0, 0), (0, atom_pad - num_atoms)))
        bt = bt.reshape(1, num_actions * atom_pad)
        return wt.astype(jnp.bfloat16), bt.astype(jnp.float32)

    return [prep(w1, b1), prep(w2, b2), prep(w3, b3),
            prep(vw1, vb1), prep_atoms(vw2, vb2),
            prep(aw1, ab1), prep_adv(aw2, ab2)]


@functools.partial(jax.jit, static_argnames=("num_actions", "num_atoms"))
def dueling_dqn_forward(x, params, num_actions=NUM_ACTIONS, num_atoms=NUM_ATOMS):
    atom_pad = _round_up(num_atoms, 128)
    batch, input_dim = x.shape

    # Pad batch to a sublane multiple and pick a batch tile (<=512 rows keeps
    # double-buffered x/out blocks + ~0.6 MB weights far under 32 MiB VMEM on
    # every chip, including v7x's 64 MiB physical).
    b8 = _round_up(batch, 8)
    tb = min(512, b8)
    bp = _round_up(b8, tb)
    if bp != batch:
        x = jnp.pad(x, ((0, bp - batch), (0, 0)))
    x = x.astype(jnp.bfloat16)

    flat = [x]
    in_specs = [pl.BlockSpec((tb, input_dim), lambda i: (i, 0))]
    for w, b in params:
        flat += [w, b]
        in_specs.append(pl.BlockSpec(w.shape, lambda i: (0, 0)))   # resident weights
        in_specs.append(pl.BlockSpec(b.shape, lambda i: (0, 0)))

    out_cols = num_actions * atom_pad
    out = pl.pallas_call(
        functools.partial(_dqn_kernel, num_actions, num_atoms, atom_pad),
        grid=(bp // tb,),
        out_shape=jax.ShapeDtypeStruct((bp, out_cols), jnp.float32),
        in_specs=in_specs,
        out_specs=pl.BlockSpec((tb, out_cols), lambda i: (i, 0)),
        compiler_params=pltpu.CompilerParams(
            dimension_semantics=("parallel",)),
    )(*flat)

    # Lane-dense (B_pad, A*atom_pad) -> (batch, A, num_atoms); reshape + slice
    # only (no transpose / HBM round-trip).
    out = out[:batch].reshape(batch, num_actions, atom_pad)[..., :num_atoms]
    return out


if __name__ == "__main__":
    key = jax.random.PRNGKey(0)
    k_x, k_p = jax.random.split(key)

    batch = 4
    x = jax.random.normal(k_x, (batch, CLINICAL_FEATURE_COUNT), jnp.float32)
    params = init_params(k_p)

    q_dist = dueling_dqn_forward(x, params)
    q_dist = jax.block_until_ready(q_dist)

    assert q_dist.shape == (batch, NUM_ACTIONS, NUM_ATOMS)
    # distributions must be valid probabilities over atoms
    sums = jnp.sum(q_dist, axis=-1)
    assert bool(jnp.all(jnp.isfinite(q_dist)))
    assert bool(jnp.all(jnp.abs(sums - 1.0) < 1e-4))

    # (support buffer / expected-Q reduction from get_q_values, plain JAX glue)
    support = jnp.linspace(V_MIN, V_MAX, NUM_ATOMS)
    _q_values = jnp.sum(q_dist * support, axis=-1)
    _q_values = jax.block_until_ready(_q_values)

    print("KERNEL_OK")
</pallas_src>

<mosaic_0001>
module attributes {stable_mosaic.version = 11 : i64} {
  func.func @_dqn_kernel(%arg0: i32, %arg1: memref<8x32xbf16, #tpu.memory_space<vmem>>, %arg2: memref<32x64xbf16, #tpu.memory_space<vmem>>, %arg3: memref<1x64xf32, #tpu.memory_space<vmem>>, %arg4: memref<64x128xbf16, #tpu.memory_space<vmem>>, %arg5: memref<1x128xf32, #tpu.memory_space<vmem>>, %arg6: memref<128x256xbf16, #tpu.memory_space<vmem>>, %arg7: memref<1x256xf32, #tpu.memory_space<vmem>>, %arg8: memref<256x128xbf16, #tpu.memory_space<vmem>>, %arg9: memref<1x128xf32, #tpu.memory_space<vmem>>, %arg10: memref<128x128xbf16, #tpu.memory_space<vmem>>, %arg11: memref<1x128xf32, #tpu.memory_space<vmem>>, %arg12: memref<256x128xbf16, #tpu.memory_space<vmem>>, %arg13: memref<1x128xf32, #tpu.memory_space<vmem>>, %arg14: memref<128x640xbf16, #tpu.memory_space<vmem>>, %arg15: memref<1x640xf32, #tpu.memory_space<vmem>>, %arg16: memref<8x640xf32, #tpu.memory_space<vmem>>) attributes {dimension_semantics = [#tpu.dimension_semantics<parallel>], iteration_bounds = array<i64: 1>, scalar_prefetch = 0 : i64, scratch_operands = 0 : i64, tpu.core_type = #tpu.core_type<tc>, window_params = [{transform_indices = @transform_0, window_bounds = array<i64: 8, 32>}, {pipeline_mode = #tpu.pipeline_mode<synchronous>, transform_indices = @transform_1, window_bounds = array<i64: 32, 64>}, {pipeline_mode = #tpu.pipeline_mode<synchronous>, transform_indices = @transform_2, window_bounds = array<i64: 1, 64>}, {pipeline_mode = #tpu.pipeline_mode<synchronous>, transform_indices = @transform_3, window_bounds = array<i64: 64, 128>}, {pipeline_mode = #tpu.pipeline_mode<synchronous>, transform_indices = @transform_4, window_bounds = array<i64: 1, 128>}, {pipeline_mode = #tpu.pipeline_mode<synchronous>, transform_indices = @transform_5, window_bounds = array<i64: 128, 256>}, {pipeline_mode = #tpu.pipeline_mode<synchronous>, transform_indices = @transform_6, window_bounds = array<i64: 1, 256>}, {pipeline_mode = #tpu.pipeline_mode<synchronous>, transform_indices = @transform_7, window_bounds = array<i64: 256, 128>}, {pipeline_mode = #tpu.pipeline_mode<synchronous>, transform_indices = @transform_8, window_bounds = array<i64: 1, 128>}, {pipeline_mode = #tpu.pipeline_mode<synchronous>, transform_indices = @transform_9, window_bounds = array<i64: 128, 128>}, {pipeline_mode = #tpu.pipeline_mode<synchronous>, transform_indices = @transform_10, window_bounds = array<i64: 1, 128>}, {pipeline_mode = #tpu.pipeline_mode<synchronous>, transform_indices = @transform_11, window_bounds = array<i64: 256, 128>}, {pipeline_mode = #tpu.pipeline_mode<synchronous>, transform_indices = @transform_12, window_bounds = array<i64: 1, 128>}, {pipeline_mode = #tpu.pipeline_mode<synchronous>, transform_indices = @transform_13, window_bounds = array<i64: 128, 640>}, {pipeline_mode = #tpu.pipeline_mode<synchronous>, transform_indices = @transform_14, window_bounds = array<i64: 1, 640>}, {transform_indices = @transform_15, window_bounds = array<i64: 8, 640>}]} {
    %c0 = arith.constant 0 : index
    %c0_0 = arith.constant 0 : index
    %0 = vector.load %arg1[%c0, %c0_0] : memref<8x32xbf16, #tpu.memory_space<vmem>>, vector<8x32xbf16>
    %c0_1 = arith.constant 0 : index
    %c0_2 = arith.constant 0 : index
    %1 = vector.load %arg2[%c0_1, %c0_2] : memref<32x64xbf16, #tpu.memory_space<vmem>>, vector<32x64xbf16>
    %cst = arith.constant dense<0.000000e+00> : vector<8x64xf32>
    %2 = tpu.matmul %0, %1, %cst {dimension_numbers = #tpu.dot_dimension_numbers<[1], [0], [0], [1], [0, 0, 1, 1], [], []>} : vector<8x32xbf16>, vector<32x64xbf16>, vector<8x64xf32> -> vector<8x64xf32>
    %c0_3 = arith.constant 0 : index
    %c0_4 = arith.constant 0 : index
    %3 = vector.load %arg3[%c0_3, %c0_4] : memref<1x64xf32, #tpu.memory_space<vmem>>, vector<1x64xf32>
    %4 = vector.broadcast %3 : vector<1x64xf32> to vector<8x64xf32>
    %5 = arith.addf %2, %4 : vector<8x64xf32>
    %cst_5 = arith.constant 0.000000e+00 : f32
    %6 = vector.broadcast %cst_5 : f32 to vector<8x64xf32>
    %7 = arith.maximumf %5, %6 : vector<8x64xf32>
    %8 = arith.truncf %7 : vector<8x64xf32> to vector<8x64xbf16>
    %c0_6 = arith.constant 0 : index
    %c0_7 = arith.constant 0 : index
    %9 = vector.load %arg4[%c0_6, %c0_7] : memref<64x128xbf16, #tpu.memory_space<vmem>>, vector<64x128xbf16>
    %cst_8 = arith.constant dense<0.000000e+00> : vector<8x128xf32>
    %10 = tpu.matmul %8, %9, %cst_8 {dimension_numbers = #tpu.dot_dimension_numbers<[1], [0], [0], [1], [0, 0, 1, 1], [], []>} : vector<8x64xbf16>, vector<64x128xbf16>, vector<8x128xf32> -> vector<8x128xf32>
    %c0_9 = arith.constant 0 : index
    %c0_10 = arith.constant 0 : index
    %11 = vector.load %arg5[%c0_9, %c0_10] : memref<1x128xf32, #tpu.memory_space<vmem>>, vector<1x128xf32>
    %12 = vector.broadcast %11 : vector<1x128xf32> to vector<8x128xf32>
    %13 = arith.addf %10, %12 : vector<8x128xf32>
    %cst_11 = arith.constant 0.000000e+00 : f32
    %14 = vector.broadcast %cst_11 : f32 to vector<8x128xf32>
    %15 = arith.maximumf %13, %14 : vector<8x128xf32>
    %16 = arith.truncf %15 : vector<8x128xf32> to vector<8x128xbf16>
    %c0_12 = arith.constant 0 : index
    %c0_13 = arith.constant 0 : index
    %17 = vector.load %arg6[%c0_12, %c0_13] : memref<128x256xbf16, #tpu.memory_space<vmem>>, vector<128x256xbf16>
    %cst_14 = arith.constant dense<0.000000e+00> : vector<8x256xf32>
    %18 = tpu.matmul %16, %17, %cst_14 {dimension_numbers = #tpu.dot_dimension_numbers<[1], [0], [0], [1], [0, 0, 1, 1], [], []>} : vector<8x128xbf16>, vector<128x256xbf16>, vector<8x256xf32> -> vector<8x256xf32>
    %c0_15 = arith.constant 0 : index
    %c0_16 = arith.constant 0 : index
    %19 = vector.load %arg7[%c0_15, %c0_16] : memref<1x256xf32, #tpu.memory_space<vmem>>, vector<1x256xf32>
    %20 = vector.broadcast %19 : vector<1x256xf32> to vector<8x256xf32>
    %21 = arith.addf %18, %20 : vector<8x256xf32>
    %cst_17 = arith.constant 0.000000e+00 : f32
    %22 = vector.broadcast %cst_17 : f32 to vector<8x256xf32>
    %23 = arith.maximumf %21, %22 : vector<8x256xf32>
    %24 = arith.truncf %23 : vector<8x256xf32> to vector<8x256xbf16>
    %c0_18 = arith.constant 0 : index
    %c0_19 = arith.constant 0 : index
    %25 = vector.load %arg8[%c0_18, %c0_19] : memref<256x128xbf16, #tpu.memory_space<vmem>>, vector<256x128xbf16>
    %cst_20 = arith.constant dense<0.000000e+00> : vector<8x128xf32>
    %26 = tpu.matmul %24, %25, %cst_20 {dimension_numbers = #tpu.dot_dimension_numbers<[1], [0], [0], [1], [0, 0, 1, 1], [], []>} : vector<8x256xbf16>, vector<256x128xbf16>, vector<8x128xf32> -> vector<8x128xf32>
    %c0_21 = arith.constant 0 : index
    %c0_22 = arith.constant 0 : index
    %27 = vector.load %arg9[%c0_21, %c0_22] : memref<1x128xf32, #tpu.memory_space<vmem>>, vector<1x128xf32>
    %28 = vector.broadcast %27 : vector<1x128xf32> to vector<8x128xf32>
    %29 = arith.addf %26, %28 : vector<8x128xf32>
    %cst_23 = arith.constant 0.000000e+00 : f32
    %30 = vector.broadcast %cst_23 : f32 to vector<8x128xf32>
    %31 = arith.maximumf %29, %30 : vector<8x128xf32>
    %32 = arith.truncf %31 : vector<8x128xf32> to vector<8x128xbf16>
    %c0_24 = arith.constant 0 : index
    %c0_25 = arith.constant 0 : index
    %33 = vector.load %arg10[%c0_24, %c0_25] : memref<128x128xbf16, #tpu.memory_space<vmem>>, vector<128x128xbf16>
    %cst_26 = arith.constant dense<0.000000e+00> : vector<8x128xf32>
    %34 = tpu.matmul %32, %33, %cst_26 {dimension_numbers = #tpu.dot_dimension_numbers<[1], [0], [0], [1], [0, 0, 1, 1], [], []>} : vector<8x128xbf16>, vector<128x128xbf16>, vector<8x128xf32> -> vector<8x128xf32>
    %c0_27 = arith.constant 0 : index
    %c0_28 = arith.constant 0 : index
    %35 = vector.load %arg11[%c0_27, %c0_28] : memref<1x128xf32, #tpu.memory_space<vmem>>, vector<1x128xf32>
    %36 = vector.broadcast %35 : vector<1x128xf32> to vector<8x128xf32>
    %37 = arith.addf %34, %36 : vector<8x128xf32>
    %c0_29 = arith.constant 0 : index
    %c0_30 = arith.constant 0 : index
    %38 = vector.load %arg12[%c0_29, %c0_30] : memref<256x128xbf16, #tpu.memory_space<vmem>>, vector<256x128xbf16>
    %cst_31 = arith.constant dense<0.000000e+00> : vector<8x128xf32>
    %39 = tpu.matmul %24, %38, %cst_31 {dimension_numbers = #tpu.dot_dimension_numbers<[1], [0], [0], [1], [0, 0, 1, 1], [], []>} : vector<8x256xbf16>, vector<256x128xbf16>, vector<8x128xf32> -> vector<8x128xf32>
    %c0_32 = arith.constant 0 : index
    %c0_33 = arith.constant 0 : index
    %40 = vector.load %arg13[%c0_32, %c0_33] : memref<1x128xf32, #tpu.memory_space<vmem>>, vector<1x128xf32>
    %41 = vector.broadcast %40 : vector<1x128xf32> to vector<8x128xf32>
    %42 = arith.addf %39, %41 : vector<8x128xf32>
    %cst_34 = arith.constant 0.000000e+00 : f32
    %43 = vector.broadcast %cst_34 : f32 to vector<8x128xf32>
    %44 = arith.maximumf %42, %43 : vector<8x128xf32>
    %45 = arith.truncf %44 : vector<8x128xf32> to vector<8x128xbf16>
    %c0_35 = arith.constant 0 : index
    %c0_36 = arith.constant 0 : index
    %46 = vector.load %arg14[%c0_35, %c0_36] : memref<128x640xbf16, #tpu.memory_space<vmem>>, vector<128x640xbf16>
    %cst_37 = arith.constant dense<0.000000e+00> : vector<8x640xf32>
    %47 = tpu.matmul %45, %46, %cst_37 {dimension_numbers = #tpu.dot_dimension_numbers<[1], [0], [0], [1], [0, 0, 1, 1], [], []>} : vector<8x128xbf16>, vector<128x640xbf16>, vector<8x640xf32> -> vector<8x640xf32>
    %c0_38 = arith.constant 0 : index
    %c0_39 = arith.constant 0 : index
    %48 = vector.load %arg15[%c0_38, %c0_39] : memref<1x640xf32, #tpu.memory_space<vmem>>, vector<1x640xf32>
    %49 = vector.broadcast %48 : vector<1x640xf32> to vector<8x640xf32>
    %50 = arith.addf %47, %49 : vector<8x640xf32>
    %51 = vector.extract_strided_slice %50 {offsets = [0, 0], sizes = [8, 128], strides = [1, 1]} : vector<8x640xf32> to vector<8x128xf32>
    %52 = vector.extract_strided_slice %50 {offsets = [0, 128], sizes = [8, 128], strides = [1, 1]} : vector<8x640xf32> to vector<8x128xf32>
    %53 = arith.addf %51, %52 : vector<8x128xf32>
    %54 = vector.extract_strided_slice %50 {offsets = [0, 256], sizes = [8, 128], strides = [1, 1]} : vector<8x640xf32> to vector<8x128xf32>
    %55 = arith.addf %53, %54 : vector<8x128xf32>
    %56 = vector.extract_strided_slice %50 {offsets = [0, 384], sizes = [8, 128], strides = [1, 1]} : vector<8x640xf32> to vector<8x128xf32>
    %57 = arith.addf %55, %56 : vector<8x128xf32>
    %58 = vector.extract_strided_slice %50 {offsets = [0, 512], sizes = [8, 128], strides = [1, 1]} : vector<8x640xf32> to vector<8x128xf32>
    %59 = arith.addf %57, %58 : vector<8x128xf32>
    %cst_40 = arith.constant 2.000000e-01 : f32
    %60 = vector.broadcast %cst_40 : f32 to vector<8x128xf32>
    %61 = arith.mulf %59, %60 : vector<8x128xf32>
    %62 = tpu.iota {dimensions = array<i32: 1>} : vector<1x128xi32>
    %c51_i32 = arith.constant 51 : i32
    %63 = vector.broadcast %c51_i32 : i32 to vector<1x128xi32>
    %64 = arith.cmpi slt, %62, %63 : vector<1x128xi32>
    %65 = vector.extract_strided_slice %50 {offsets = [0, 0], sizes = [8, 128], strides = [1, 1]} : vector<8x640xf32> to vector<8x128xf32>
    %66 = arith.addf %37, %65 : vector<8x128xf32>
    %67 = arith.subf %66, %61 : vector<8x128xf32>
    %cst_41 = arith.constant -1.000000e+30 : f32
    %68 = vector.shape_cast %64 : vector<1x128xi1> to vector<1x128xi1>
    %69 = vector.broadcast %68 : vector<1x128xi1> to vector<8x128xi1>
    %70 = vector.broadcast %cst_41 : f32 to vector<8x128xf32>
    %71 = arith.select %69, %67, %70 : vector<8x128xi1>, vector<8x128xf32>
    %cst_42 = arith.constant dense<0xFF800000> : vector<8xf32>
    %72 = vector.multi_reduction <maximumf>, %71, %cst_42 [1] : vector<8x128xf32> to vector<8xf32>
    %73 = vector.shape_cast %72 : vector<8xf32> to vector<8x1xf32>
    %74 = vector.broadcast %73 : vector<8x1xf32> to vector<8x128xf32>
    %75 = arith.subf %71, %74 : vector<8x128xf32>
    %76 = math.exp %75 : vector<8x128xf32>
    %cst_43 = arith.constant dense<0.000000e+00> : vector<8xf32>
    %77 = vector.multi_reduction <add>, %76, %cst_43 [1] : vector<8x128xf32> to vector<8xf32>
    %78 = vector.shape_cast %77 : vector<8xf32> to vector<8x1xf32>
    %79 = vector.broadcast %78 : vector<8x1xf32> to vector<8x128xf32>
    %80 = arith.divf %76, %79 : vector<8x128xf32>
    %c0_44 = arith.constant 0 : index
    %c0_45 = arith.constant 0 : index
    %81 = vector.load %arg16[%c0_44, %c0_45] : memref<8x640xf32, #tpu.memory_space<vmem>>, vector<8x128xf32>
    tpu.vector_store %arg16[%c0_44, %c0_45], %80 {strides = array<i32>} : memref<8x640xf32, #tpu.memory_space<vmem>>, vector<8x128xf32>,
    %82 = vector.extract_strided_slice %50 {offsets = [0, 128], sizes = [8, 128], strides = [1, 1]} : vector<8x640xf32> to vector<8x128xf32>
    %83 = arith.addf %37, %82 : vector<8x128xf32>
    %84 = arith.subf %83, %61 : vector<8x128xf32>
    %cst_46 = arith.constant -1.000000e+30 : f32
    %85 = vector.shape_cast %64 : vector<1x128xi1> to vector<1x128xi1>
    %86 = vector.broadcast %85 : vector<1x128xi1> to vector<8x128xi1>
    %87 = vector.broadcast %cst_46 : f32 to vector<8x128xf32>
    %88 = arith.select %86, %84, %87 : vector<8x128xi1>, vector<8x128xf32>
    %cst_47 = arith.constant dense<0xFF800000> : vector<8xf32>
    %89 = vector.multi_reduction <maximumf>, %88, %cst_47 [1] : vector<8x128xf32> to vector<8xf32>
    %90 = vector.shape_cast %89 : vector<8xf32> to vector<8x1xf32>
    %91 = vector.broadcast %90 : vector<8x1xf32> to vector<8x128xf32>
    %92 = arith.subf %88, %91 : vector<8x128xf32>
    %93 = math.exp %92 : vector<8x128xf32>
    %cst_48 = arith.constant dense<0.000000e+00> : vector<8xf32>
    %94 = vector.multi_reduction <add>, %93, %cst_48 [1] : vector<8x128xf32> to vector<8xf32>
    %95 = vector.shape_cast %94 : vector<8xf32> to vector<8x1xf32>
    %96 = vector.broadcast %95 : vector<8x1xf32> to vector<8x128xf32>
    %97 = arith.divf %93, %96 : vector<8x128xf32>
    %c0_49 = arith.constant 0 : index
    %c128 = arith.constant 128 : index
    %98 = vector.load %arg16[%c0_49, %c128] : memref<8x640xf32, #tpu.memory_space<vmem>>, vector<8x128xf32>
    tpu.vector_store %arg16[%c0_49, %c128], %97 {strides = array<i32>} : memref<8x640xf32, #tpu.memory_space<vmem>>, vector<8x128xf32>,
    %99 = vector.extract_strided_slice %50 {offsets = [0, 256], sizes = [8, 128], strides = [1, 1]} : vector<8x640xf32> to vector<8x128xf32>
    %100 = arith.addf %37, %99 : vector<8x128xf32>
    %101 = arith.subf %100, %61 : vector<8x128xf32>
    %cst_50 = arith.constant -1.000000e+30 : f32
    %102 = vector.shape_cast %64 : vector<1x128xi1> to vector<1x128xi1>
    %103 = vector.broadcast %102 : vector<1x128xi1> to vector<8x128xi1>
    %104 = vector.broadcast %cst_50 : f32 to vector<8x128xf32>
    %105 = arith.select %103, %101, %104 : vector<8x128xi1>, vector<8x128xf32>
    %cst_51 = arith.constant dense<0xFF800000> : vector<8xf32>
    %106 = vector.multi_reduction <maximumf>, %105, %cst_51 [1] : vector<8x128xf32> to vector<8xf32>
    %107 = vector.shape_cast %106 : vector<8xf32> to vector<8x1xf32>
    %108 = vector.broadcast %107 : vector<8x1xf32> to vector<8x128xf32>
    %109 = arith.subf %105, %108 : vector<8x128xf32>
    %110 = math.exp %109 : vector<8x128xf32>
    %cst_52 = arith.constant dense<0.000000e+00> : vector<8xf32>
    %111 = vector.multi_reduction <add>, %110, %cst_52 [1] : vector<8x128xf32> to vector<8xf32>
    %112 = vector.shape_cast %111 : vector<8xf32> to vector<8x1xf32>
    %113 = vector.broadcast %112 : vector<8x1xf32> to vector<8x128xf32>
    %114 = arith.divf %110, %113 : vector<8x128xf32>
    %c0_53 = arith.constant 0 : index
    %c256 = arith.constant 256 : index
    %115 = vector.load %arg16[%c0_53, %c256] : memref<8x640xf32, #tpu.memory_space<vmem>>, vector<8x128xf32>
    tpu.vector_store %arg16[%c0_53, %c256], %114 {strides = array<i32>} : memref<8x640xf32, #tpu.memory_space<vmem>>, vector<8x128xf32>,
    %116 = vector.extract_strided_slice %50 {offsets = [0, 384], sizes = [8, 128], strides = [1, 1]} : vector<8x640xf32> to vector<8x128xf32>
    %117 = arith.addf %37, %116 : vector<8x128xf32>
    %118 = arith.subf %117, %61 : vector<8x128xf32>
    %cst_54 = arith.constant -1.000000e+30 : f32
    %119 = vector.shape_cast %64 : vector<1x128xi1> to vector<1x128xi1>
    %120 = vector.broadcast %119 : vector<1x128xi1> to vector<8x128xi1>
    %121 = vector.broadcast %cst_54 : f32 to vector<8x128xf32>
    %122 = arith.select %120, %118, %121 : vector<8x128xi1>, vector<8x128xf32>
    %cst_55 = arith.constant dense<0xFF800000> : vector<8xf32>
    %123 = vector.multi_reduction <maximumf>, %122, %cst_55 [1] : vector<8x128xf32> to vector<8xf32>
    %124 = vector.shape_cast %123 : vector<8xf32> to vector<8x1xf32>
    %125 = vector.broadcast %124 : vector<8x1xf32> to vector<8x128xf32>
    %126 = arith.subf %122, %125 : vector<8x128xf32>
    %127 = math.exp %126 : vector<8x128xf32>
    %cst_56 = arith.constant dense<0.000000e+00> : vector<8xf32>
    %128 = vector.multi_reduction <add>, %127, %cst_56 [1] : vector<8x128xf32> to vector<8xf32>
    %129 = vector.shape_cast %128 : vector<8xf32> to vector<8x1xf32>
    %130 = vector.broadcast %129 : vector<8x1xf32> to vector<8x128xf32>
    %131 = arith.divf %127, %130 : vector<8x128xf32>
    %c0_57 = arith.constant 0 : index
    %c384 = arith.constant 384 : index
    %132 = vector.load %arg16[%c0_57, %c384] : memref<8x640xf32, #tpu.memory_space<vmem>>, vector<8x128xf32>
    tpu.vector_store %arg16[%c0_57, %c384], %131 {strides = array<i32>} : memref<8x640xf32, #tpu.memory_space<vmem>>, vector<8x128xf32>,
    %133 = vector.extract_strided_slice %50 {offsets = [0, 512], sizes = [8, 128], strides = [1, 1]} : vector<8x640xf32> to vector<8x128xf32>
    %134 = arith.addf %37, %133 : vector<8x128xf32>
    %135 = arith.subf %134, %61 : vector<8x128xf32>
    %cst_58 = arith.constant -1.000000e+30 : f32
    %136 = vector.shape_cast %64 : vector<1x128xi1> to vector<1x128xi1>
    %137 = vector.broadcast %136 : vector<1x128xi1> to vector<8x128xi1>
    %138 = vector.broadcast %cst_58 : f32 to vector<8x128xf32>
    %139 = arith.select %137, %135, %138 : vector<8x128xi1>, vector<8x128xf32>
    %cst_59 = arith.constant dense<0xFF800000> : vector<8xf32>
    %140 = vector.multi_reduction <maximumf>, %139, %cst_59 [1] : vector<8x128xf32> to vector<8xf32>
    %141 = vector.shape_cast %140 : vector<8xf32> to vector<8x1xf32>
    %142 = vector.broadcast %141 : vector<8x1xf32> to vector<8x128xf32>
    %143 = arith.subf %139, %142 : vector<8x128xf32>
    %144 = math.exp %143 : vector<8x128xf32>
    %cst_60 = arith.constant dense<0.000000e+00> : vector<8xf32>
    %145 = vector.multi_reduction <add>, %144, %cst_60 [1] : vector<8x128xf32> to vector<8xf32>
    %146 = vector.shape_cast %145 : vector<8xf32> to vector<8x1xf32>
    %147 = vector.broadcast %146 : vector<8x1xf32> to vector<8x128xf32>
    %148 = arith.divf %144, %147 : vector<8x128xf32>
    %c0_61 = arith.constant 0 : index
    %c512 = arith.constant 512 : index
    %149 = vector.load %arg16[%c0_61, %c512] : memref<8x640xf32, #tpu.memory_space<vmem>>, vector<8x128xf32>
    tpu.vector_store %arg16[%c0_61, %c512], %148 {strides = array<i32>} : memref<8x640xf32, #tpu.memory_space<vmem>>, vector<8x128xf32>,
    return
  }
  func.func @transform_0(%arg0: i32) -> (i32, i32) {
    %c0_i32 = arith.constant 0 : i32
    %c0_i32_0 = arith.constant 0 : i32
    return %arg0, %c0_i32 : i32, i32
  }
  func.func @transform_1(%arg0: i32) -> (i32, i32) {
    %c0_i32 = arith.constant 0 : i32
    %c0_i32_0 = arith.constant 0 : i32
    %c0_i32_1 = arith.constant 0 : i32
    return %c0_i32, %c0_i32_0 : i32, i32
  }
  func.func @transform_2(%arg0: i32) -> (i32, i32) {
    %c0_i32 = arith.constant 0 : i32
    %c0_i32_0 = arith.constant 0 : i32
    %c0_i32_1 = arith.constant 0 : i32
    return %c0_i32, %c0_i32_0 : i32, i32
  }
  func.func @transform_3(%arg0: i32) -> (i32, i32) {
    %c0_i32 = arith.constant 0 : i32
    %c0_i32_0 = arith.constant 0 : i32
    %c0_i32_1 = arith.constant 0 : i32
    return %c0_i32, %c0_i32_0 : i32, i32
  }
  func.func @transform_4(%arg0: i32) -> (i32, i32) {
    %c0_i32 = arith.constant 0 : i32
    %c0_i32_0 = arith.constant 0 : i32
    %c0_i32_1 = arith.constant 0 : i32
    return %c0_i32, %c0_i32_0 : i32, i32
  }
  func.func @transform_5(%arg0: i32) -> (i32, i32) {
    %c0_i32 = arith.constant 0 : i32
    %c0_i32_0 = arith.constant 0 : i32
    %c0_i32_1 = arith.constant 0 : i32
    return %c0_i32, %c0_i32_0 : i32, i32
  }
  func.func @transform_6(%arg0: i32) -> (i32, i32) {
    %c0_i32 = arith.constant 0 : i32
    %c0_i32_0 = arith.constant 0 : i32
    %c0_i32_1 = arith.constant 0 : i32
    return %c0_i32, %c0_i32_0 : i32, i32
  }
  func.func @transform_7(%arg0: i32) -> (i32, i32) {
    %c0_i32 = arith.constant 0 : i32
    %c0_i32_0 = arith.constant 0 : i32
    %c0_i32_1 = arith.constant 0 : i32
    return %c0_i32, %c0_i32_0 : i32, i32
  }
  func.func @transform_8(%arg0: i32) -> (i32, i32) {
    %c0_i32 = arith.constant 0 : i32
    %c0_i32_0 = arith.constant 0 : i32
    %c0_i32_1 = arith.constant 0 : i32
    return %c0_i32, %c0_i32_0 : i32, i32
  }
  func.func @transform_9(%arg0: i32) -> (i32, i32) {
    %c0_i32 = arith.constant 0 : i32
    %c0_i32_0 = arith.constant 0 : i32
    %c0_i32_1 = arith.constant 0 : i32
    return %c0_i32, %c0_i32_0 : i32, i32
  }
  func.func @transform_10(%arg0: i32) -> (i32, i32) {
    %c0_i32 = arith.constant 0 : i32
    %c0_i32_0 = arith.constant 0 : i32
    %c0_i32_1 = arith.constant 0 : i32
    return %c0_i32, %c0_i32_0 : i32, i32
  }
  func.func @transform_11(%arg0: i32) -> (i32, i32) {
    %c0_i32 = arith.constant 0 : i32
    %c0_i32_0 = arith.constant 0 : i32
    %c0_i32_1 = arith.constant 0 : i32
    return %c0_i32, %c0_i32_0 : i32, i32
  }
  func.func @transform_12(%arg0: i32) -> (i32, i32) {
    %c0_i32 = arith.constant 0 : i32
    %c0_i32_0 = arith.constant 0 : i32
    %c0_i32_1 = arith.constant 0 : i32
    return %c0_i32, %c0_i32_0 : i32, i32
  }
  func.func @transform_13(%arg0: i32) -> (i32, i32) {
    %c0_i32 = arith.constant 0 : i32
    %c0_i32_0 = arith.constant 0 : i32
    %c0_i32_1 = arith.constant 0 : i32
    return %c0_i32, %c0_i32_0 : i32, i32
  }
  func.func @transform_14(%arg0: i32) -> (i32, i32) {
    %c0_i32 = arith.constant 0 : i32
    %c0_i32_0 = arith.constant 0 : i32
    %c0_i32_1 = arith.constant 0 : i32
    return %c0_i32, %c0_i32_0 : i32, i32
  }
  func.func @transform_15(%arg0: i32) -> (i32, i32) {
    %c0_i32 = arith.constant 0 : i32
    %c0_i32_0 = arith.constant 0 : i32
    return %arg0, %c0_i32 : i32, i32
  }
}

</mosaic_0001>

<bundles_post_ra>
// kernel: dueling_dqn_forward.1
= control target key start
LH: loop header
LB: loop body
LE: loop exit
PB: predicated region body
PF: predicated region fallthrough
CT: control target
= control target key end

     0   :  { %s2208_s0 = inlined_call_operand.vmem [shape: bf16[8,32], index: 0, kind: input, shape index: {}]   ;;  %s2209_s1 = inlined_call_operand.vmem [shape: bf16[32,64], index: 1, kind: input, shape index: {}]   ;;  %s2210_s2 = inlined_call_operand.vmem [shape: f32[1,64], index: 2, kind: input, shape index: {}]   ;;  %s2211_s3 = inlined_call_operand.hbm [shape: bf16[64,128], index: 3, kind: input, shape index: {}]   ;;  %s2212_s4 = inlined_call_operand.vmem [shape: f32[1,128], index: 4, kind: input, shape index: {}]   ;;  %s2213_s5 = inlined_call_operand.hbm [shape: bf16[128,256], index: 5, kind: input, shape index: {}]   ;;  %s2214_s6 = inlined_call_operand.vmem [shape: f32[1,256], index: 6, kind: input, shape index: {}]   ;;  %s2215_s7 = inlined_call_operand.hbm [shape: bf16[256,128], index: 7, kind: input, shape index: {}]   ;;  %s2216_s8 = inlined_call_operand.vmem [shape: f32[1,128], index: 8, kind: input, shape index: {}]   ;;  %s2217_s9 = inlined_call_operand.hbm [shape: bf16[128,128], index: 9, kind: input, shape index: {}]   ;;  %s2218_s10 = inlined_call_operand.vmem [shape: f32[1,128], index: 10, kind: input, shape index: {}]   ;;  %s2219_s11 = inlined_call_operand.hbm [shape: bf16[256,128], index: 11, kind: input, shape index: {}]   ;;  %s2220_s12 = inlined_call_operand.vmem [shape: f32[1,128], index: 12, kind: input, shape index: {}]   ;;  %s2221_s13 = inlined_call_operand.hbm [shape: bf16[128,640], index: 13, kind: input, shape index: {}]   ;;  %s2222_s14 = inlined_call_operand.vmem [shape: f32[1,640], index: 14, kind: input, shape index: {}]   ;;  %s2223_s15 = inlined_call_operand.vmem [shape: f32[8,640], index: 15, kind: output, shape index: {}]  }
   0x1   :  { %2225 = sst [smem:[#allocation16_spill]] %s2223_s15 }
   0x2   :  { %20 = vsyncpa [#allocation3], 0 }
   0x3   :  { %21 = vsyncpa [#allocation5], 0 }
   0x4   :  { %22 = vsyncpa [#allocation8], 0 }
   0x5   :  { %23 = vsyncpa [#allocation11], 0  ;;  %s1934_s18 = smov [#allocation4]   ;;  %s1794_s22 = scalar_lea.hbm %s2213_s5, 2048 }
   0x6   :  { %s49_s19 = sshll.u32 %s1934_s18, 4  ;;  %p1795_p0 = scmp.ne.s32.totalorder %s2213_s5, %s1794_s22  ;;  %s50_s19 = int_to_ptr.vmem [resolvable:$true] %s49_s19 }
   0x7   :  { %p1798_p1 = scmp.lt.u32.totalorder %s1794_s22, %s2213_s5 }
   0x9   :  { %p1800_p2 = pnand %p1798_p1, %p1795_p0 }
   0xb   :  { %1803 = shalt.err (!%p1800_p2)
}
   0xc   :  { %s1804_s27 = scalar_lea.vmem %s50_s19, 2048  ;;  %p1809_p4 = scmp.lt.s32.totalorder %s50_s19, %s50_s19 }
   0xd   :  { %p1805_p3 = scmp.ne.s32.totalorder %s50_s19, %s1804_s27  ;;  %p1810_p5 = scmp.lt.s32.totalorder %s1804_s27, %s1804_s27 }
   0xf   :  { %p1811_p6 = por %p1810_p5, %p1809_p4 }
  0x11   :  { %p1812_p7 = pnand %p1811_p6, %p1805_p3 }
  0x13   :  { %1815 = shalt.err (!%p1812_p7)
}
  0x14   :  { %s1935_s28 = smov 128   ;;  %s1936_s29 = smov 8  }
  0x15   :  { %55 = dma.hbm_to_vmem [thread:$0]  %s2213_s5, 2048, %s50_s19, [#allocation5], %s1935_s28, %s1935_s28, %s1936_s29  }
  0x16   :  { %s1937_s17 = smov [#allocation7]   ;;  %s1938_s20 = smov [#allocation2]  }
  0x17   :  { %s77_s18 = sshll.u32 %s1937_s17, 4  ;;  %s35_s21 = sshll.u32 %s1938_s20, 4  ;;  %s78_s18 = int_to_ptr.vmem [resolvable:$true] %s77_s18  ;;  %s36_s21 = int_to_ptr.vmem [resolvable:$true] %s35_s21 }
  0x18   :  { %s1816_s24 = scalar_lea.hbm %s2217_s9, 1024 }
  0x19   :  { %p1817_p8 = scmp.ne.s32.totalorder %s2217_s9, %s1816_s24  ;;  %p1820_p9 = scmp.lt.u32.totalorder %s1816_s24, %s2217_s9 }
  0x1b   :  { %p1822_p10 = pnand %p1820_p9, %p1817_p8 }
  0x1d   :  { %1825 = shalt.err (!%p1822_p10)
}
  0x1e   :  { %s1826_s5 = scalar_lea.vmem %s78_s18, 1024  ;;  %p1831_p12 = scmp.lt.s32.totalorder %s78_s18, %s78_s18 }
  0x1f   :  { %p1827_p11 = scmp.ne.s32.totalorder %s78_s18, %s1826_s5  ;;  %p1832_p13 = scmp.lt.s32.totalorder %s1826_s5, %s1826_s5 }
  0x21   :  { %p1833_p0 = por %p1832_p13, %p1831_p12 }
  0x23   :  { %p1834_p1 = pnand %p1833_p0, %p1827_p11 }
  0x25   :  { %1837 = shalt.err (!%p1834_p1)
}
  0x26   :  { %s1939_s19 = smov 64   ;;  %s1940_s28 = smov 4  }
  0x27   :  { %83 = dma.hbm_to_vmem [thread:$0]  %s2217_s9, 1024, %s78_s18, [#allocation8], %s1939_s19, %s1939_s19, %s1940_s28  }
  0x28   :  { %s1838_s17 = scalar_lea.hbm %s2211_s3, 512 }
  0x29   :  { %p1839_p2 = scmp.ne.s32.totalorder %s2211_s3, %s1838_s17  ;;  %p1842_p3 = scmp.lt.u32.totalorder %s1838_s17, %s2211_s3 }
  0x2b   :  { %p1844_p4 = pnand %p1842_p3, %p1839_p2 }
  0x2d   :  { %1847 = shalt.err (!%p1844_p4)
}
  0x2e   :  { %s1848_s25 = scalar_lea.vmem %s36_s21, 512  ;;  %p1853_p6 = scmp.lt.s32.totalorder %s36_s21, %s36_s21 }
  0x2f   :  { %p1849_p5 = scmp.ne.s32.totalorder %s36_s21, %s1848_s25  ;;  %p1854_p7 = scmp.lt.s32.totalorder %s1848_s25, %s1848_s25 }
  0x31   :  { %p1855_p8 = por %p1854_p7, %p1853_p6 }
  0x33   :  { %p1856_p9 = pnand %p1855_p8, %p1849_p5 }
  0x35   :  { %1859 = shalt.err (!%p1856_p9)
}
  0x36   :  { %41 = dma.hbm_to_vmem [thread:$0]  %s2211_s3, 512, %s36_s21, [#allocation3], %s1939_s19, %s1939_s19, %s1940_s28  }
  0x37   :  { %s1941_s26 = smov [#allocation6]   ;;  %s1942_s5 = smov [#allocation9]  }
  0x38   :  { %s63_s27 = sshll.u32 %s1941_s26, 4  ;;  %s91_s29 = sshll.u32 %s1942_s5, 4  ;;  %s64_s27 = int_to_ptr.vmem [resolvable:$true] %s63_s27  ;;  %s92_s29 = int_to_ptr.vmem [resolvable:$true] %s91_s29 }
  0x39   :  { %s1860_s16 = scalar_lea.hbm %s2215_s7, 2048 }
  0x3a   :  { %p1861_p10 = scmp.ne.s32.totalorder %s2215_s7, %s1860_s16  ;;  %p1864_p11 = scmp.lt.u32.totalorder %s1860_s16, %s2215_s7 }
  0x3c   :  { %p1866_p12 = pnand %p1864_p11, %p1861_p10 }
  0x3e   :  { %1869 = shalt.err (!%p1866_p12)
}
  0x3f   :  { %s1870_s3 = scalar_lea.vmem %s64_s27, 2048  ;;  %p1875_p0 = scmp.lt.s32.totalorder %s64_s27, %s64_s27 }
  0x40   :  { %p1871_p13 = scmp.ne.s32.totalorder %s64_s27, %s1870_s3  ;;  %p1876_p1 = scmp.lt.s32.totalorder %s1870_s3, %s1870_s3 }
  0x42   :  { %p1877_p2 = por %p1876_p1, %p1875_p0 }
  0x44   :  { %p1878_p3 = pnand %p1877_p2, %p1871_p13 }
  0x46   :  { %1881 = shalt.err (!%p1878_p3)
}
  0x47   :  { %69 = dma.hbm_to_vmem [thread:$0]  %s2215_s7, 2048, %s64_s27, [#allocation5], %s1939_s19, %s1939_s19, %s1940_s28  }
  0x48   :  { %s1882_s18 = scalar_lea.hbm %s2219_s11, 2048 }
  0x49   :  { %p1883_p4 = scmp.ne.s32.totalorder %s2219_s11, %s1882_s18  ;;  %p1886_p5 = scmp.lt.u32.totalorder %s1882_s18, %s2219_s11 }
  0x4b   :  { %p1888_p6 = pnand %p1886_p5, %p1883_p4 }
  0x4d   :  { %1891 = shalt.err (!%p1888_p6)
}
  0x4e   :  { %s1892_s16 = scalar_lea.vmem %s92_s29, 2048  ;;  %p1897_p8 = scmp.lt.s32.totalorder %s92_s29, %s92_s29 }
  0x4f   :  { %p1893_p7 = scmp.ne.s32.totalorder %s92_s29, %s1892_s16  ;;  %p1898_p9 = scmp.lt.s32.totalorder %s1892_s16, %s1892_s16 }
  0x51   :  { %p1899_p10 = por %p1898_p9, %p1897_p8 }
  0x53   :  { %p1900_p11 = pnand %p1899_p10, %p1893_p7 }
  0x55   :  { %1903 = shalt.err (!%p1900_p11)
}
  0x56   :  { %97 = dma.hbm_to_vmem [thread:$0]  %s2219_s11, 2048, %s92_s29, [#allocation8], %s1939_s19, %s1939_s19, %s1940_s28  }
  0x57   :  { %s1943_s17 = smov [#allocation10]   ;;  %s1904_s3 = scalar_lea.hbm %s2221_s13, 5120 }
  0x58   :  { %s105_s20 = sshll.u32 %s1943_s17, 4  ;;  %p1905_p12 = scmp.ne.s32.totalorder %s2221_s13, %s1904_s3  ;;  %s106_s20 = int_to_ptr.vmem [resolvable:$true] %s105_s20 }
  0x59   :  { %p1908_p13 = scmp.lt.u32.totalorder %s1904_s3, %s2221_s13 }
  0x5b   :  { %p1910_p0 = pnand %p1908_p13, %p1905_p12 }
  0x5d   :  { %1913 = shalt.err (!%p1910_p0)
}
  0x5e   :  { %s1914_s18 = scalar_lea.vmem %s106_s20, 5120  ;;  %p1919_p2 = scmp.lt.s32.totalorder %s106_s20, %s106_s20 }
  0x5f   :  { %p1915_p1 = scmp.ne.s32.totalorder %s106_s20, %s1914_s18  ;;  %p1920_p3 = scmp.lt.s32.totalorder %s1914_s18, %s1914_s18 }
  0x61   :  { %p1921_p4 = por %p1920_p3, %p1919_p2 }
  0x63   :  { %p1922_p5 = pnand %p1921_p4, %p1915_p1 }
  0x65   :  { %1925 = shalt.err (!%p1922_p5)
}
  0x66   :  { %s1944_s11 = smov 320   ;;  %s1945_s19 = smov 20  }
  0x67   :  { %111 = dma.hbm_to_vmem [thread:$0]  %s2221_s13, 5120, %s106_s20, [#allocation11], %s1944_s11, %s1944_s11, %s1945_s19  }
  0x68   :  { %1926 = dma.done.wait [#allocation3], 512  }
  0x69   :  { %1927 = vsyncadd [#allocation3], 4294966784 }
  0x6a   :  { %1928 = dma.done.wait [#allocation5], 4096  }
  0x6b   :  { %1929 = vsyncadd [#allocation5], 4294963200 }
  0x6c   :  { %1930 = dma.done.wait [#allocation8], 3072  }
  0x6d   :  { %1931 = vsyncadd [#allocation8], 4294964224 }
  0x6e   :  { %1932 = dma.done.wait [#allocation11], 5120  }
  0x6f   :  { %1933 = vsyncadd [#allocation11], 4294962176  ;;  %v1946_v0 = vmov 0.0   ;;  %vm1947_vm0 = vmmov 0   ;;  %v1648_v1 = vld [vmem:[%s2209_s1] sm:$0xff]   ;;  %v1649_v2 = vld [vmem:[%s2209_s1 + $0x8] sm:$0xff]  }
  0x70   :  { %1573 = vmatprep.subr.bf16.mxu1 %v1946_v0  ;;  %1577 = vmatprep.mubr.msk.bf16.mxu1 %vm1947_vm0, %v1946_v0  ;;  %v133_v3 = vld [vmem:[%s2208_s0] sm:$0xf]  ;;  %vm157_vm1 = vcmask 261120   ;;  %v1651_v5 = vld [vmem:[#allocation2 + $0x8] sm:$0xff]   ;;  %v1652_v6 = vld [vmem:[#allocation2 + $0x10] sm:$0xff]   ;;  %vm242_vm2 = vcmask 523264  }
  0x71   :  { %1574 = vmatpush3.bf16.msra.mxu1 %v1648_v1  ;;  %v1650_v4 = vld [vmem:[#allocation2] sm:$0xff]   ;;  %v1653_v7 = vld [vmem:[#allocation2 + $0x18] sm:$0xff]   ;;  %v1948_v32 = vmov 0   ;;  %v1680_v35 = vld [vmem:[#allocation6 + $0x48] sm:$0xff]   ;;  %v306_v1 = vlaneseq  ;;  %s2226_s21 = sld [smem:[#allocation16_spill]] }
  0x72   :  { %1575 = vmatprep.subr.bf16.mxu1 %v1946_v0  ;;  %v1654_v8 = vld [vmem:[#allocation4 + $0x4] ss:$8 sps:$4 sm:$0xff]   ;;  %v1656_v9 = vld [vmem:[#allocation4] ss:$8 sps:$4 sm:$0xff]   ;;  %v1657_v10 = vld [vmem:[#allocation4 + $0x14] ss:$8 sps:$4 sm:$0xff]   ;;  %428 = vmatprep.mubr.bf16.mxu0 %v1948_v32 }
  0x73   :  { %396 = vmatprep.subr.bf16.mxu0 %v1654_v8  ;;  %v1659_v11 = vld [vmem:[#allocation4 + $0x10] ss:$8 sps:$4 sm:$0xff]   ;;  %v1660_v12 = vld [vmem:[#allocation4 + $0x24] ss:$8 sps:$4 sm:$0xff]   ;;  %v1662_v13 = vld [vmem:[#allocation4 + $0x20] ss:$8 sps:$4 sm:$0xff]  }
  0x74   :  { %397 = vmatpush1.bf16.msra.mxu0 %v1656_v9  ;;  %v1663_v14 = vld [vmem:[#allocation4 + $0x34] ss:$8 sps:$4 sm:$0xff]   ;;  %v1665_v15 = vld [vmem:[#allocation4 + $0x30] ss:$8 sps:$4 sm:$0xff]   ;;  %v1666_v16 = vld [vmem:[#allocation4 + $0x44] ss:$8 sps:$4 sm:$0xff]  }
  0x75   :  { %1576 = vmatpush3.bf16.msra.mxu1 %v1649_v2  ;;  %398 = vmatprep.subr.bf16.mxu0 %v1657_v10  ;;  %v1668_v17 = vld [vmem:[#allocation4 + $0x40] ss:$8 sps:$4 sm:$0xff]   ;;  %v1669_v18 = vld [vmem:[#allocation4 + $0x54] ss:$8 sps:$4 sm:$0xff]   ;;  %v1671_v19 = vld [vmem:[#allocation4 + $0x50] ss:$8 sps:$4 sm:$0xff]  }
  0x76   :  { %1581 = vmatprep.subr.bf16.mxu1 %v1946_v0  ;;  %v1672_v20 = vld [vmem:[#allocation4 + $0x64] ss:$8 sps:$4 sm:$0xff]   ;;  %v1394_v21 = vld [vmem:[%s2210_s2] ss:$0 sm:$0xff]  ;;  %v1675_v30 = vld [vmem:[#allocation4 + $0x74] ss:$8 sps:$4 sm:$0xff]  }
  0x77   :  { %v1674_v29 = vld [vmem:[#allocation4 + $0x60] ss:$8 sps:$4 sm:$0xff]   ;;  %v1677_v31 = vld [vmem:[#allocation4 + $0x70] ss:$8 sps:$4 sm:$0xff]   ;;  %v2149_v2 = vshrl.u32 %v306_v1, 7 }
  0x78   :  { %1578 = vmatmul.mubr.msk.bf16.vlgmr.msra.gmra.mrb[0].mxu1 %vm157_vm1, %v133_v3  ;;  %399 = vmatpush1.bf16.msra.mxu0 %v1659_v11  ;;  %v1678_v33 = vld [vmem:[#allocation6 + $0x40] sm:$0xff]   ;;  %v1681_v36 = vld [vmem:[#allocation6 + $0x8] sm:$0xff]   ;;  %v1682_v37 = vld [vmem:[#allocation6 + $0x50] sm:$0xff]  }
  0x79   :  { %1582 = vmatpush3.bf16.msra.mxu1 %v1650_v4  ;;  %1589 = vmatprep.mubr.msk.bf16.mxu1 %vm1947_vm0, %v1946_v0  ;;  %v1679_v34 = vld [vmem:[#allocation6] sm:$0xff]   ;;  %v1683_v38 = vld [vmem:[#allocation6 + $0x10] sm:$0xff]   ;;  %v1684_v39 = vld [vmem:[#allocation6 + $0x58] sm:$0xff]   ;;  %v308_v3 = vsub.s32 0, %v2149_v2 }
  0x7a   :  { %1583 = vmatprep.subr.bf16.mxu1 %v1946_v0  ;;  %400 = vmatprep.subr.bf16.mxu0 %v1660_v12  ;;  %v1685_v40 = vld [vmem:[#allocation6 + $0x18] sm:$0xff]   ;;  %v1686_v41 = vld [vmem:[#allocation6 + $0x60] sm:$0xff]   ;;  %v1688_v43 = vld [vmem:[#allocation6 + $0x68] sm:$0xff]  }
  0x7b   :  { %v1687_v42 = vld [vmem:[#allocation6 + $0x20] sm:$0xff]   ;;  %v1689_v44 = vld [vmem:[#allocation6 + $0x28] sm:$0xff]   ;;  %v1690_v53 = vld [vmem:[#allocation6 + $0x70] sm:$0xff]  }
  0x7c   :  { %401 = vmatpush1.bf16.msra.mxu0 %v1662_v13  ;;  %v1398_v45 = vld [vmem:[%s2212_s4] ss:$0 sm:$0xff]  ;;  %v1691_v54 = vld [vmem:[#allocation6 + $0x30] sm:$0xff]   ;;  %v1692_v55 = vld [vmem:[#allocation6 + $0x78] sm:$0xff]  }
  0x7d   :  { %1584 = vmatpush3.bf16.msra.mxu1 %v1651_v5  ;;  %402 = vmatprep.subr.bf16.mxu0 %v1663_v14  ;;  %v1693_v56 = vld [vmem:[#allocation6 + $0x38] sm:$0xff]   ;;  %v1694_v57 = vld [vmem:[#allocation9 + $0x40] sm:$0xff]   ;;  %v1711_v59 = vld [vmem:[#allocation7 + $0x8] sm:$0xff]   ;;  %v312_v5 = vsub.s32 1, %v2149_v2 }
  0x7e   :  { %1585 = vmatprep.subr.bf16.mxu1 %v1946_v0  ;;  %v1710_v58 = vld [vmem:[#allocation7] sm:$0xff]   ;;  %v1712_v60 = vld [vmem:[#allocation7 + $0x10] sm:$0xff]   ;;  %v1713_v61 = vld [vmem:[#allocation7 + $0x18] sm:$0xff]  }
  0x7f   :  { %v1714_v62 = vld [vmem:[#allocation7 + $0x20] sm:$0xff]   ;;  %v1715_v63 = vld [vmem:[#allocation7 + $0x28] sm:$0xff]  }
  0x80   :  { %403 = vmatpush1.bf16.msra.mxu0 %v1665_v15  ;;  %v304_v4 = vld [vmem:[%s2214_s6] sm:$0x3] }
  0x81   :  { %1586 = vmatpush3.bf16.msra.mxu1 %v1652_v6  ;;  %404 = vmatprep.subr.bf16.mxu0 %v1666_v16  ;;  %v309_v6 = vrot.slane %v304_v4, %v308_v3 }
  0x82   :  { %1587 = vmatprep.subr.bf16.mxu1 %v1946_v0 }
  0x84   :  { %405 = vmatpush1.bf16.msra.mxu0 %v1668_v17  ;;  %v1695_v17 = vld [vmem:[#allocation9] sm:$0xff]  }
  0x85   :  { %1588 = vmatpush3.bf16.msra.mxu1 %v1653_v7  ;;  %406 = vmatprep.subr.bf16.mxu0 %v1669_v18  ;;  %v313_v7 = vrot.slane %v304_v4, %v312_v5  ;;  %v1724_v4 = vld [vmem:[#allocation10 + $0x28] ss:$20 sps:$4 sm:$0xff]  }
  0x86   :  { %1511 = vmatprep.subr.bf16.mxu1 %v1678_v33  ;;  %v1709_v33 = vld [vmem:[#allocation9 + $0x38] sm:$0xff]  }
  0x88   :  { %407 = vmatpush1.bf16.msra.mxu0 %v1671_v19  ;;  %v1696_v19 = vld [vmem:[#allocation9 + $0x48] sm:$0xff]  }
  0x89   :  { %408 = vmatprep.subr.bf16.mxu0 %v1672_v20  ;;  %v1697_v20 = vld [vmem:[#allocation9 + $0x8] sm:$0xff]  }
  0x8c   :  { %409 = vmatpush1.bf16.msra.mxu0 %v1674_v29  ;;  %v1706_v29 = vld [vmem:[#allocation9 + $0x70] sm:$0xff]  }
  0x8d   :  { %410 = vmatprep.subr.bf16.mxu0 %v1675_v30  ;;  %v1707_v30 = vld [vmem:[#allocation9 + $0x30] sm:$0xff]  }
  0x90   :  { %411 = vmatpush1.bf16.msra.mxu0 %v1677_v31  ;;  %v1708_v31 = vld [vmem:[#allocation9 + $0x78] sm:$0xff]  }
  0x91   :  { %1593 = vmatprep.subr.bf16.mxu0 %v1946_v0 }
 0x14b   :  { %v195_v22 = vpop.f32.mrb[0].mxu1 }
 0x14c   :  { %v196_v23 = vadd.f32 %v1394_v21, %v195_v22  ;;  %v1579_v24 = vpop.f32.mrb[1].mxu1  ;;  %v1698_v21 = vld [vmem:[#allocation9 + $0x50] sm:$0xff]  }
 0x14d   :  { %v198_v25 = vpop.f32.mrb[2].mxu1  ;;  %v1699_v22 = vld [vmem:[#allocation9 + $0x10] sm:$0xff]   ;;  %v1701_v24 = vld [vmem:[#allocation9 + $0x18] sm:$0xff]  }
 0x14e   :  { %v201_v26 = vmax.f32 %v196_v23, 0.0  ;;  %v1580_v27 = vpop.f32.mrb[3].mxu1  ;;  %v1700_v23 = vld [vmem:[#allocation9 + $0x58] sm:$0xff]   ;;  %v1702_v25 = vld [vmem:[#allocation9 + $0x60] sm:$0xff]  }
 0x14f   :  { %v1704_v27 = vld [vmem:[#allocation9 + $0x68] sm:$0xff]  }
 0x150   :  { %v202_v28 = vpack.c.bf16 %v201_v26, %v201_v26  ;;  %v1703_v26 = vld [vmem:[#allocation9 + $0x20] sm:$0xff]  }
 0x152   :  { %1590 = vmatmul.mubr.msk.bf16.vlgmr.msra.gmra.mrb[4].mxu1 %vm242_vm2, %v202_v28  ;;  %v1705_v28 = vld [vmem:[#allocation9 + $0x28] sm:$0xff]  }
 0x153   :  { %1512 = vmatpush3.bf16.msra.mxu1 %v1679_v34  ;;  %v1716_v34 = vld [vmem:[#allocation7 + $0x30] sm:$0xff]  }
 0x154   :  { %1513 = vmatprep.subr.bf16.mxu1 %v1680_v35  ;;  %v1717_v35 = vld [vmem:[#allocation7 + $0x38] sm:$0xff]  }
 0x157   :  { %1514 = vmatpush3.bf16.msra.mxu1 %v1681_v36  ;;  %v1720_v36 = vld [vmem:[#allocation10 + $0x4] ss:$20 sps:$4 sm:$0xff]  }
 0x158   :  { %1515 = vmatprep.subr.bf16.mxu1 %v1682_v37  ;;  %v1721_v37 = vld [vmem:[#allocation10 + $0x8] ss:$20 sps:$4 sm:$0xff]  }
 0x15b   :  { %1516 = vmatpush3.bf16.msra.mxu1 %v1683_v38  ;;  %v1723_v38 = vld [vmem:[#allocation10 + $0xc] ss:$20 sps:$4 sm:$0xff]  }
 0x15c   :  { %1517 = vmatprep.subr.bf16.mxu1 %v1684_v39  ;;  %v1727_v39 = vld [vmem:[#allocation10 + $0x30] ss:$20 sps:$4 sm:$0xff]  }
 0x15f   :  { %1518 = vmatpush3.bf16.msra.mxu1 %v1685_v40  ;;  %v1729_v40 = vld [vmem:[#allocation10 + $0x34] ss:$20 sps:$4 sm:$0xff]  }
 0x160   :  { %1519 = vmatprep.subr.bf16.mxu1 %v1686_v41  ;;  %v1733_v41 = vld [vmem:[#allocation10 + $0x58] ss:$20 sps:$4 sm:$0xff]  }
 0x163   :  { %1520 = vmatpush3.bf16.msra.mxu1 %v1687_v42  ;;  %v1735_v42 = vld [vmem:[#allocation10 + $0x5c] ss:$20 sps:$4 sm:$0xff]  }
 0x164   :  { %1521 = vmatprep.subr.bf16.mxu1 %v1688_v43  ;;  %v1739_v43 = vld [vmem:[#allocation10 + $0x80] ss:$20 sps:$4 sm:$0xff]  }
 0x167   :  { %1522 = vmatpush3.bf16.msra.mxu1 %v1689_v44  ;;  %v1741_v44 = vld [vmem:[#allocation10 + $0x84] ss:$20 sps:$4 sm:$0xff]  }
 0x168   :  { %1523 = vmatprep.subr.bf16.mxu1 %v1690_v53 }
 0x16b   :  { %1524 = vmatpush3.bf16.msra.mxu1 %v1691_v54  ;;  %v1420_v54 = vld [vmem:[%s2216_s8] ss:$0 sm:$0xff] }
 0x16c   :  { %1525 = vmatprep.subr.bf16.mxu1 %v1692_v55 }
 0x16f   :  { %1526 = vmatpush3.bf16.msra.mxu1 %v1693_v56 }
 0x170   :  { %1542 = vmatprep.subr.bf16.mxu1 %v1694_v57 }
 0x225   :  { %v280_v46 = vpop.f32.mrb[4].mxu1 }
 0x226   :  { %v281_v47 = vadd.f32 %v1398_v45, %v280_v46  ;;  %v1591_v48 = vpop.f32.mrb[5].mxu1  ;;  %v1745_v45 = vld [vmem:[#allocation10 + $0xa8] ss:$20 sps:$4 sm:$0xff]   ;;  %v1747_v46 = vld [vmem:[#allocation10 + $0xac] ss:$20 sps:$4 sm:$0xff]  }
 0x227   :  { %v283_v49 = vpop.f32.mrb[6].mxu1  ;;  %v1753_v48 = vld [vmem:[#allocation10 + $0xd4] ss:$20 sps:$4 sm:$0xff]  }
 0x228   :  { %v286_v50 = vmax.f32 %v281_v47, 0.0  ;;  %v1592_v51 = vpop.f32.mrb[7].mxu1  ;;  %v1751_v47 = vld [vmem:[#allocation10 + $0xd0] ss:$20 sps:$4 sm:$0xff]  }
 0x229   :  { %v1759_v49 = vld [vmem:[#allocation10 + $0xfc] ss:$20 sps:$4 sm:$0xff]   ;;  %v1765_v51 = vld [vmem:[#allocation10 + $0x124] ss:$20 sps:$4 sm:$0xff]  }
 0x22a   :  { %v287_v52 = vpack.c.bf16 %v286_v50, %v286_v50  ;;  %v1757_v50 = vld [vmem:[#allocation10 + $0xf8] ss:$20 sps:$4 sm:$0xff]  }
 0x22c   :  { %429 = vmatmul.mubr.bf16.vlgmr.msra.gmra.mrb[0].mxu0 %v287_v52  ;;  %v1763_v52 = vld [vmem:[#allocation10 + $0x120] ss:$20 sps:$4 sm:$0xff]  }
 0x22d   :  { %1609 = vmatprep.mubr.msk.bf16.mxu0 %vm1947_vm0, %v1946_v0  ;;  %1594 = vmatpush3.bf16.msra.mxu0 %v1710_v58 }
 0x22e   :  { %1595 = vmatprep.subr.bf16.mxu0 %v1946_v0 }
 0x231   :  { %1596 = vmatpush3.bf16.msra.mxu0 %v1711_v59 }
 0x232   :  { %1597 = vmatprep.subr.bf16.mxu0 %v1946_v0 }
 0x235   :  { %1598 = vmatpush3.bf16.msra.mxu0 %v1712_v60 }
 0x236   :  { %1599 = vmatprep.subr.bf16.mxu0 %v1946_v0 }
 0x239   :  { %1600 = vmatpush3.bf16.msra.mxu0 %v1713_v61  ;;  %v1718_v61 = vld [vmem:[#allocation10] ss:$20 sps:$4 sm:$0xff]  }
 0x23a   :  { %1601 = vmatprep.subr.bf16.mxu0 %v1946_v0 }
 0x23d   :  { %1602 = vmatpush3.bf16.msra.mxu0 %v1714_v62 }
 0x23e   :  { %1603 = vmatprep.subr.bf16.mxu0 %v1946_v0 }
 0x241   :  { %1604 = vmatpush3.bf16.msra.mxu0 %v1715_v63  ;;  %v1726_v63 = vld [vmem:[#allocation10 + $0x2c] ss:$20 sps:$4 sm:$0xff]  }
 0x242   :  { %1605 = vmatprep.subr.bf16.mxu0 %v1946_v0 }
 0x245   :  { %1606 = vmatpush3.bf16.msra.mxu0 %v1716_v34  ;;  %v1773_v34 = vld [vmem:[#allocation10 + $0x128] ss:$20 sps:$4 sm:$0xff]  }
 0x246   :  { %1607 = vmatprep.subr.bf16.mxu0 %v1946_v0 }
 0x249   :  { %1608 = vmatpush3.bf16.msra.mxu0 %v1717_v35 }
 0x24a   :  { %1189 = vmatprep.subr.bf16.mxu0 %v1720_v36 }
 0x2ff   :  { %v430_v8 = vpop.f32.mrb[0].mxu0 }
 0x300   :  { %v431_v9 = vadd.f32 %v430_v8, %v309_v6  ;;  %v432_v10 = vpop.f32.mrb[1].mxu0  ;;  %v1732_v6 = vld [vmem:[#allocation10 + $0x54] ss:$20 sps:$4 sm:$0xff]   ;;  %v1738_v8 = vld [vmem:[#allocation10 + $0x7c] ss:$20 sps:$4 sm:$0xff]  }
 0x301   :  { %v433_v11 = vadd.f32 %v432_v10, %v313_v7  ;;  %v434_v12 = vpop.f32.mrb[2].mxu0  ;;  %v1730_v7 = vld [vmem:[#allocation10 + $0x50] ss:$20 sps:$4 sm:$0xff]  }
 0x302   :  { %v437_v13 = vmax.f32 %v431_v9, 0.0  ;;  %v435_v14 = vpop.f32.mrb[3].mxu0  ;;  %v1736_v9 = vld [vmem:[#allocation10 + $0x78] ss:$20 sps:$4 sm:$0xff]  }
 0x303   :  { %v438_v15 = vmax.f32 %v433_v11, 0.0  ;;  %v1744_v10 = vld [vmem:[#allocation10 + $0xa4] ss:$20 sps:$4 sm:$0xff]   ;;  %v1742_v11 = vld [vmem:[#allocation10 + $0xa0] ss:$20 sps:$4 sm:$0xff]  }
 0x304   :  { %v439_v18 = vpack.c.bf16 %v437_v13, %v437_v13  ;;  %v1750_v12 = vld [vmem:[#allocation10 + $0xcc] ss:$20 sps:$4 sm:$0xff]   ;;  %v1748_v13 = vld [vmem:[#allocation10 + $0xc8] ss:$20 sps:$4 sm:$0xff]  }
 0x305   :  { %v440_v16 = vpack.c.bf16 %v438_v15, %v438_v15  ;;  %v1756_v14 = vld [vmem:[#allocation10 + $0xf4] ss:$20 sps:$4 sm:$0xff]  }
 0x307   :  { %608 = vmatprep.mubr.bf16.mxu1 %v440_v16 }
 0x308   :  { %609 = vmatmul.mubr.bf16.vlgmr.msra.gmra.mrb[8].mxu1 %v439_v18 }
 0x309   :  { %1543 = vmatpush3.bf16.msra.mxu1 %v1695_v17  ;;  %896 = vmatprep.mubr.bf16.mxu1 %v440_v16  ;;  %v1762_v16 = vld [vmem:[#allocation10 + $0x11c] ss:$20 sps:$4 sm:$0xff]   ;;  %v1446_v17 = vld [vmem:[%s2220_s12] ss:$0 sm:$0xff] }
 0x30a   :  { %1544 = vmatprep.subr.bf16.mxu1 %v1696_v19 }
 0x30d   :  { %1545 = vmatpush3.bf16.msra.mxu1 %v1697_v20 }
 0x30e   :  { %1546 = vmatprep.subr.bf16.mxu1 %v1698_v21 }
 0x311   :  { %1547 = vmatpush3.bf16.msra.mxu1 %v1699_v22  ;;  %v1760_v22 = vld [vmem:[#allocation10 + $0x118] ss:$20 sps:$4 sm:$0xff]  }
 0x312   :  { %1548 = vmatprep.subr.bf16.mxu1 %v1700_v23 }
 0x315   :  { %1549 = vmatpush3.bf16.msra.mxu1 %v1701_v24 }
 0x316   :  { %1550 = vmatprep.subr.bf16.mxu1 %v1702_v25  ;;  %v1766_v25 = vld [vmem:[#allocation10 + $0x10] ss:$20 sps:$4 sm:$0xff]  }
 0x319   :  { %1551 = vmatpush3.bf16.msra.mxu1 %v1703_v26 }
 0x31a   :  { %1552 = vmatprep.subr.bf16.mxu1 %v1704_v27  ;;  %v1767_v27 = vld [vmem:[#allocation10 + $0x38] ss:$20 sps:$4 sm:$0xff]  }
 0x31d   :  { %1553 = vmatpush3.bf16.msra.mxu1 %v1705_v28  ;;  %v1768_v28 = vld [vmem:[#allocation10 + $0x60] ss:$20 sps:$4 sm:$0xff]  }
 0x31e   :  { %1554 = vmatprep.subr.bf16.mxu1 %v1706_v29  ;;  %v1769_v29 = vld [vmem:[#allocation10 + $0x88] ss:$20 sps:$4 sm:$0xff]  }
 0x321   :  { %1555 = vmatpush3.bf16.msra.mxu1 %v1707_v30  ;;  %v1770_v30 = vld [vmem:[#allocation10 + $0xb0] ss:$20 sps:$4 sm:$0xff]  }
 0x322   :  { %1556 = vmatprep.subr.bf16.mxu1 %v1708_v31  ;;  %v1771_v31 = vld [vmem:[#allocation10 + $0xd8] ss:$20 sps:$4 sm:$0xff]  }
 0x325   :  { %1557 = vmatpush3.bf16.msra.mxu1 %v1709_v33  ;;  %v1772_v33 = vld [vmem:[#allocation10 + $0x100] ss:$20 sps:$4 sm:$0xff]  }
 0x326   :  { %1230 = vmatprep.subr.bf16.mxu1 %v1723_v38 }
 0x328   :  { %897 = vmatmul.mubr.bf16.vlgmr.msra.gmra.mrb[12].mxu1 %v439_v18 }
 0x329   :  { %1262 = vmatprep.mubr.bf16.mxu1 %v1948_v32  ;;  %1231 = vmatpush1.bf16.msra.mxu1 %v1721_v37 }
 0x32a   :  { %1232 = vmatprep.subr.bf16.mxu1 %v1729_v40  ;;  %v954_v40 = vld [vmem:[%s2222_s14] sm:$0x1f] }
 0x32d   :  { %1233 = vmatpush1.bf16.msra.mxu1 %v1727_v39  ;;  %v966_v39 = vsub.s32 2, %v2149_v2 }
 0x32e   :  { %1234 = vmatprep.subr.bf16.mxu1 %v1735_v42  ;;  %v959_v42 = vrot.slane %v954_v40, %v308_v3 }
 0x331   :  { %1235 = vmatpush1.bf16.msra.mxu1 %v1733_v41  ;;  %v970_v41 = vsub.s32 3, %v2149_v2 }
 0x332   :  { %1236 = vmatprep.subr.bf16.mxu1 %v1741_v44  ;;  %v963_v44 = vrot.slane %v954_v40, %v312_v5 }
 0x335   :  { %1237 = vmatpush1.bf16.msra.mxu1 %v1739_v43  ;;  %v967_v43 = vrot.slane %v954_v40, %v966_v39 }
 0x336   :  { %1238 = vmatprep.subr.bf16.mxu1 %v1747_v46 }
 0x339   :  { %1239 = vmatpush1.bf16.msra.mxu1 %v1745_v45  ;;  %v971_v45 = vrot.slane %v954_v40, %v970_v41 }
 0x33a   :  { %1240 = vmatprep.subr.bf16.mxu1 %v1753_v48 }
 0x33d   :  { %1241 = vmatpush1.bf16.msra.mxu1 %v1751_v47 }
 0x33e   :  { %1242 = vmatprep.subr.bf16.mxu1 %v1759_v49 }
 0x341   :  { %1243 = vmatpush1.bf16.msra.mxu1 %v1757_v50 }
 0x342   :  { %1244 = vmatprep.subr.bf16.mxu1 %v1765_v51 }
 0x345   :  { %1245 = vmatpush1.bf16.msra.mxu1 %v1763_v52 }
 0x3db   :  { %v1527_v53 = vpop.f32.mrb[8].mxu1 }
 0x3dc   :  { %v1528_v55 = vpop.f32.mrb[9].mxu1 }
 0x3dd   :  { %v1529_v56 = vadd.f32 %v1528_v55, %v1527_v53  ;;  %v1530_v57 = vpop.f32.mrb[10].mxu1 }
 0x3de   :  { %v1531_v58 = vpop.f32.mrb[11].mxu1 }
 0x3df   :  { %v611_v59 = vadd.f32 %v1529_v56, %v1420_v54 }
 0x3e1   :  { %v616_v60 = vmax.f32 %v611_v59, 0.0 }
 0x3e3   :  { %v617_v62 = vpack.c.bf16 %v616_v60, %v616_v60 }
 0x3e5   :  { %1610 = vmatmul.mubr.bf16.vlgmr.msra.gmra.mrb[4].mxu0 %v617_v62 }
 0x3e6   :  { %1190 = vmatpush1.bf16.msra.mxu0 %v1718_v61  ;;  %1221 = vmatprep.mubr.bf16.mxu0 %v1948_v32  ;;  %v1754_v32 = vld [vmem:[#allocation10 + $0xf0] ss:$20 sps:$4 sm:$0xff]  }
 0x3e7   :  { %1191 = vmatprep.subr.bf16.mxu0 %v1726_v63 }
 0x3ea   :  { %1192 = vmatpush1.bf16.msra.mxu0 %v1724_v4  ;;  %v974_v4 = vsub.s32 4, %v2149_v2 }
 0x3eb   :  { %1193 = vmatprep.subr.bf16.mxu0 %v1732_v6 }
 0x3ec   :  { %v975_v6 = vrot.slane %v954_v40, %v974_v4 }
 0x3ee   :  { %1194 = vmatpush1.bf16.msra.mxu0 %v1730_v7 }
 0x3ef   :  { %1195 = vmatprep.subr.bf16.mxu0 %v1738_v8 }
 0x3f2   :  { %1196 = vmatpush1.bf16.msra.mxu0 %v1736_v9 }
 0x3f3   :  { %1197 = vmatprep.subr.bf16.mxu0 %v1744_v10 }
 0x3f6   :  { %1198 = vmatpush1.bf16.msra.mxu0 %v1742_v11  ;;  %v1317_v11 = vand.u32 127, %v306_v1 }
 0x3f7   :  { %1199 = vmatprep.subr.bf16.mxu0 %v1750_v12 }
 0x3f8   :  { %vm1318_vm3 = vcmp.lt.s32.totalorder %v1317_v11, 51 }
 0x3fa   :  { %1200 = vmatpush1.bf16.msra.mxu0 %v1748_v13 }
 0x3fb   :  { %v1558_v15 = vpop.f32.mrb[12].mxu1  ;;  %1201 = vmatprep.subr.bf16.mxu0 %v1756_v14 }
 0x3fc   :  { %v1559_v18 = vpop.f32.mrb[13].mxu1 }
 0x3fd   :  { %v1560_v19 = vadd.f32 %v1559_v18, %v1558_v15  ;;  %v1561_v20 = vpop.f32.mrb[14].mxu1 }
 0x3fe   :  { %v1562_v21 = vpop.f32.mrb[15].mxu1  ;;  %1202 = vmatpush1.bf16.msra.mxu0 %v1754_v32 }
 0x3ff   :  { %v899_v23 = vadd.f32 %v1560_v19, %v1446_v17  ;;  %1203 = vmatprep.subr.bf16.mxu0 %v1762_v16 }
 0x401   :  { %v904_v24 = vmax.f32 %v899_v23, 0.0 }
 0x402   :  { %1204 = vmatpush1.bf16.msra.mxu0 %v1760_v22 }
 0x403   :  { %v905_v26 = vpack.c.bf16 %v904_v24, %v904_v24  ;;  %1613 = vmatprep.subr.bf16.mxu0 %v1946_v0 }
 0x405   :  { %1222 = vmatmul.mubr.bf16.vlgmr.msra.gmra.mrb[8].mxu0 %v905_v26  ;;  %1263 = vmatmul.mubr.bf16.vlgmr.msra.gmra.mrb[16].mxu1 %v905_v26 }
 0x406   :  { %1614 = vmatpush3.bf16.msra.mxu0 %v1766_v25  ;;  %1629 = vmatprep.mubr.msk.bf16.mxu0 %vm1947_vm0, %v1946_v0 }
 0x407   :  { %1615 = vmatprep.subr.bf16.mxu0 %v1946_v0 }
 0x40a   :  { %1616 = vmatpush3.bf16.msra.mxu0 %v1767_v27 }
 0x40b   :  { %1617 = vmatprep.subr.bf16.mxu0 %v1946_v0 }
 0x40e   :  { %1618 = vmatpush3.bf16.msra.mxu0 %v1768_v28 }
 0x40f   :  { %1619 = vmatprep.subr.bf16.mxu0 %v1946_v0 }
 0x412   :  { %1620 = vmatpush3.bf16.msra.mxu0 %v1769_v29 }
 0x413   :  { %1621 = vmatprep.subr.bf16.mxu0 %v1946_v0 }
 0x416   :  { %1622 = vmatpush3.bf16.msra.mxu0 %v1770_v30 }
 0x417   :  { %1623 = vmatprep.subr.bf16.mxu0 %v1946_v0 }
 0x41a   :  { %1624 = vmatpush3.bf16.msra.mxu0 %v1771_v31 }
 0x41b   :  { %1625 = vmatprep.subr.bf16.mxu0 %v1946_v0 }
 0x41e   :  { %1626 = vmatpush3.bf16.msra.mxu0 %v1772_v33 }
 0x41f   :  { %1627 = vmatprep.subr.bf16.mxu0 %v1946_v0  ;;  %v1437_v0 = vld [vmem:[%s2218_s10] ss:$0 sm:$0xff] }
 0x422   :  { %1628 = vmatpush3.bf16.msra.mxu0 %v1773_v34 }
 0x425   :  { %1630 = vmatmul.mubr.bf16.vlgmr.msra.gmra.mrb[12].mxu0 %v905_v26 }
 0x4b8   :  { %v723_v35 = vpop.f32.mrb[4].mxu0 }
 0x4b9   :  { %v1611_v36 = vpop.f32.mrb[5].mxu0  ;;  %v724_v48 = vadd.f32 %v1437_v0, %v723_v35 }
 0x4ba   :  { %v726_v37 = vpop.f32.mrb[6].mxu0 }
 0x4bb   :  { %v1612_v38 = vpop.f32.mrb[7].mxu0 }
 0x4d8   :  { %v1223_v46 = vpop.f32.mrb[8].mxu0  ;;  %v1264_v47 = vpop.f32.mrb[16].mxu1 }
 0x4d9   :  { %v1224_v49 = vadd.f32 %v1223_v46, %v959_v42  ;;  %v1265_v50 = vadd.f32 %v1264_v47, %v967_v43  ;;  %v1225_v51 = vpop.f32.mrb[9].mxu0  ;;  %v1266_v52 = vpop.f32.mrb[17].mxu1 }
 0x4da   :  { %v1226_v53 = vadd.f32 %v1225_v51, %v963_v44  ;;  %v1267_v54 = vadd.f32 %v1266_v52, %v971_v45  ;;  %v1227_v55 = vpop.f32.mrb[10].mxu0  ;;  %v1268_v3 = vpop.f32.mrb[18].mxu1 }
 0x4db   :  { %v1319_v56 = vadd.f32 %v1224_v49, %v724_v48  ;;  %v1347_v57 = vadd.f32 %v1265_v50, %v724_v48  ;;  %v1228_v58 = vpop.f32.mrb[11].mxu0  ;;  %v1269_v59 = vpop.f32.mrb[19].mxu1 }
 0x4dc   :  { %v1311_v60 = vadd.f32 %v1226_v53, %v1224_v49  ;;  %v1334_v61 = vadd.f32 %v1226_v53, %v724_v48  ;;  %v1360_v62 = vadd.f32 %v1267_v54, %v724_v48 }
 0x4de   :  { %v1312_v5 = vadd.f32 %v1311_v60, %v1265_v50 }
 0x4e0   :  { %v1313_v63 = vadd.f32 %v1312_v5, %v1267_v54 }
 0x4f8   :  { %v1305_v7 = vpop.f32.mrb[12].mxu0 }
 0x4f9   :  { %v1306_v8 = vadd.f32 %v1305_v7, %v975_v6  ;;  %v1631_v9 = vpop.f32.mrb[13].mxu0 }
 0x4fa   :  { %v1308_v10 = vpop.f32.mrb[14].mxu0 }
 0x4fb   :  { %v1314_v12 = vadd.f32 %v1313_v63, %v1306_v8  ;;  %v1373_v13 = vadd.f32 %v1306_v8, %v724_v48  ;;  %v1632_v14 = vpop.f32.mrb[15].mxu0 }
 0x4fd   :  { %v1315_v32 = vmul.f32 0.2, %v1314_v12 }
 0x4ff   :  { %v1348_v15 = vsub.f32 %v1347_v57, %v1315_v32  ;;  %v1320_v16 = vsub.f32 %v1319_v56, %v1315_v32  ;;  %v1361_v17 = vsub.f32 %v1360_v62, %v1315_v32  ;;  %v1335_v18 = vsub.f32 %v1334_v61, %v1315_v32 }
 0x500   :  { %v1374_v19 = vsub.f32 %v1373_v13, %v1315_v32 }
 0x501   :  { %v1349_v20 = vsel %vm1318_vm3, %v1348_v15, -1e+30  ;;  %v1323_v21 = vsel %vm1318_vm3, %v1320_v16, -1e+30  ;;  %v1362_v2 = vsel %vm1318_vm3, %v1361_v17, -1e+30 }
 0x502   :  { %1350 = vmax.xlane.f32.xlu1 %v1349_v20  ;;  %1324 = vmax.xlane.f32.xlu0 %v1323_v21  ;;  %v1336_v22 = vsel %vm1318_vm3, %v1335_v18, -1e+30  ;;  %v1375_v23 = vsel %vm1318_vm3, %v1374_v19, -1e+30 }
 0x506   :  { %1363 = vmax.xlane.f32.xlu1 %v1362_v2  ;;  %1337 = vmax.xlane.f32.xlu0 %v1336_v22 }
 0x50a   :  { %1376 = vmax.xlane.f32.xlu0 %v1375_v23 }
 0x58f   :  { %v1351_v1 = vpop.xlane.xlu1 %1350  ;;  %v1325_v24 = vpop.xlane.xlu0 %1324 }
 0x590   :  { %v1352_v25 = vsub.f32 %v1349_v20, %v1351_v1  ;;  %v1326_v26 = vsub.f32 %v1323_v21, %v1325_v24 }
 0x592   :  { %v1327_v27 = vmul.f32 1.442695, %v1326_v26  ;;  %v1353_v30 = vmul.f32 1.442695, %v1352_v25 }
 0x593   :  { %v1364_v28 = vpop.xlane.xlu1 %1363  ;;  %v1338_v29 = vpop.xlane.xlu0 %1337 }
 0x594   :  { %v1339_v31 = vsub.f32 %v1336_v22, %v1338_v29  ;;  %1774 = vpow2.f32 %v1327_v27  ;;  %v1365_v33 = vsub.f32 %v1362_v2, %v1364_v28 }
 0x595   :  { %1776 = vpow2.f32 %v1353_v30 }
 0x596   :  { %v1340_v34 = vmul.f32 1.442695, %v1339_v31  ;;  %v1366_v37 = vmul.f32 1.442695, %v1365_v33 }
 0x597   :  { %v1377_v35 = vpop.xlane.xlu0 %1376 }
 0x598   :  { %v1378_v36 = vsub.f32 %v1375_v23, %v1377_v35  ;;  %1778 = vpow2.f32 %v1340_v34 }
 0x59a   :  { %v1379_v38 = vmul.f32 1.442695, %v1378_v36 }
 0x59c   :  { %1780 = vpow2.f32 %v1379_v38 }
 0x59d   :  { %1782 = vpow2.f32 %v1366_v37 }
 0x59e   :  { %v1775_v39 = vpop.eup %1774 }
 0x59f   :  { %1329 = vadd.xlane.f32.xlu1 %v1775_v39  ;;  %v1777_v40 = vpop.eup %1776 }
 0x5a2   :  { %v1779_v41 = vpop.eup %1778 }
 0x5a3   :  { %1355 = vadd.xlane.f32.xlu1 %v1777_v40  ;;  %1342 = vadd.xlane.f32.xlu0 %v1779_v41 }
 0x5a6   :  { %v1781_v42 = vpop.eup %1780 }
 0x5a7   :  { %v1783_v43 = vpop.eup %1782  ;;  %1381 = vadd.xlane.f32.xlu1 %v1781_v42 }
 0x5a8   :  { %1368 = vadd.xlane.f32.xlu0 %v1783_v43 }
 0x62c   :  { %v1330_v0 = vpop.xlane.xlu1 %1329 }
 0x62d   :  { %1784 = vrcp.f32 %v1330_v0 }
 0x630   :  { %v1356_v44 = vpop.xlane.xlu1 %1355  ;;  %v1343_v45 = vpop.xlane.xlu0 %1342 }
 0x631   :  { %1786 = vrcp.f32 %v1356_v44 }
 0x632   :  { %1788 = vrcp.f32 %v1343_v45 }
 0x634   :  { %v1382_v46 = vpop.xlane.xlu1 %1381 }
 0x635   :  { %v1369_v47 = vpop.xlane.xlu0 %1368  ;;  %1790 = vrcp.f32 %v1382_v46 }
 0x636   :  { %1792 = vrcp.f32 %v1369_v47 }
 0x637   :  { %v1785_v48 = vpop.eup %1784 }
 0x638   :  { %v1332_v49 = vmul.f32 %v1785_v48, %v1775_v39 }
 0x63a   :  { %1333 = vst [vmem:[%s2226_s21] sm:$0xff] %v1332_v49 }
 0x63b   :  { %v1787_v50 = vpop.eup %1786 }
 0x63c   :  { %v1789_v51 = vpop.eup %1788  ;;  %v1358_v52 = vmul.f32 %v1787_v50, %v1777_v40 }
 0x63d   :  { %v1345_v53 = vmul.f32 %v1789_v51, %v1779_v41 }
 0x63e   :  { %1359 = vst [vmem:[%s2226_s21 + $0x10] sm:$0xff] %v1358_v52 }
 0x63f   :  { %v1791_v54 = vpop.eup %1790  ;;  %1346 = vst [vmem:[%s2226_s21 + $0x8] sm:$0xff] %v1345_v53 }
 0x640   :  { %v1793_v55 = vpop.eup %1792  ;;  %v1384_v3 = vmul.f32 %v1791_v54, %v1781_v42 }
 0x641   :  { %v1371_v56 = vmul.f32 %v1793_v55, %v1783_v43 }
 0x642   :  { %1385 = vst [vmem:[%s2226_s21 + $0x20] sm:$0xff] %v1384_v3 }
 0x643   :  { %1372 = vst [vmem:[%s2226_s21 + $0x18] sm:$0xff] %v1371_v56 }
 0x644   :  { %1390 = vsyncpa [#allocation3], 1 }
 0x645   :  { %1391 = vsyncpa [#allocation5], 1 }
 0x646   :  { %1392 = vsyncpa [#allocation8], 1 }
 0x647   :  { %1393 = vsyncpa [#allocation11], 1 }

</bundles_post_ra>
